<compile_context>
chip_gen: v5e
topology: v5e:2x2
jax: 0.10.0
libtpu: 0.0.40
codegen_flags: <defaults>
</compile_context>

<pallas_src>
import jax
import jax.numpy as jnp
from jax.experimental import pallas as pl
from jax.experimental.pallas import tpu as pltpu


def _silu(v):
    return v * jax.nn.sigmoid(v)


def _round_up(n, m):
    return ((n + m - 1) // m) * m


def _cdiv(a, b):
    return -(-a // b)


def _pad2(a, rows, cols):
    pr, pc = rows - a.shape[0], cols - a.shape[1]
    if pr == 0 and pc == 0:
        return a
    return jnp.pad(a, ((0, pr), (0, pc)))


def _vmem_capacity_bytes():
    """Physical VMEM of the local TPU; falls back to v7x's 64 MiB (smallest)."""
    try:
        return int(pltpu.get_tpu_info().vmem_capacity_bytes)
    except Exception:
        return 64 << 20


def _vmem_limit(needed_bytes, capacity_bytes):
    limit = int(min(max(needed_bytes + (8 << 20), 32 << 20),
                    int(capacity_bytes * 0.9)))
    assert needed_bytes <= limit, (
        f"tiles need {needed_bytes} B of VMEM but limit is {limit} B "
        f"(capacity {capacity_bytes} B); shrink tb/tn")
    return limit


# ----------------------------- kernels --------------------------------------

def act_chain_kernel(x_ref, w1_ref, b1_ref, w2_ref, b2_ref, w3_ref, b3_ref,
                     h_ref):
    """fc1 -> SiLU -> fc2 -> SiLU -> fc3 -> SiLU for one batch tile.

    bf16 x bf16 MXU matmuls with f32 accumulation; bias add + SiLU in f32.
    """
    h = jnp.dot(x_ref[...], w1_ref[...],
                preferred_element_type=jnp.float32) + b1_ref[...]
    h = _silu(h).astype(jnp.bfloat16)
    h = jnp.dot(h, w2_ref[...],
                preferred_element_type=jnp.float32) + b2_ref[...]
    h = _silu(h).astype(jnp.bfloat16)
    h = jnp.dot(h, w3_ref[...],
                preferred_element_type=jnp.float32) + b3_ref[...]
    h_ref[...] = _silu(h).astype(h_ref.dtype)


def upmapping_kernel(h_ref, wu_ref, bu_ref, o_ref):
    """One (batch-tile, N-tile) step: out = h @ wu_tile + bu_tile.

    f32 accumulation in the MXU, cast only at the (lane-dense) store.
    """
    o_ref[...] = (jnp.dot(h_ref[...], wu_ref[...],
                          preferred_element_type=jnp.float32)
                  + bu_ref[...]).astype(o_ref.dtype)


# ----------------------------- wrapper --------------------------------------

def actor_bc_forward(x, params, *, tb=None, tn=None, out_dtype=jnp.bfloat16):
    """params: dict with w1,b1,w2,b2,w3,b3,wu,bu; weights stored (in, out)."""
    batch, fan_in = x.shape
    fan_out = params["w3"].shape[0]
    up_dim = params["wu"].shape[1]

    bf16, f32 = jnp.bfloat16, jnp.float32
    out_bytes = jnp.dtype(out_dtype).itemsize

    # Feature dims: pad only to the bf16 packing granule (16). Full-dim blocks
    # satisfy the TPU tiling rule, and silu(0) == 0 keeps zero padding exact.
    fan_in_p = _round_up(fan_in, 16)
    fan_out_p = _round_up(fan_out, 16)
    up_dim_p = _round_up(up_dim, 128)            # lane-dense output axis

    # Batch tile: multiple of 16 so bf16 sublane groups are fully packed.
    if tb is None:
        tb = min(256, _round_up(batch, 16))
    tb = _round_up(tb, 16)
    batch_p = _round_up(batch, tb)
    n_b = batch_p // tb

    vmem_cap = _vmem_capacity_bytes()

    # N (upmapping / output lane) tile.
    if tn is None:
        tn = min(up_dim_p, 2048)
        # v7x megacore: if the batch axis has a single tile, split the
        # "parallel" N axis so the second TensorCore gets work.
        if n_b == 1 and up_dim_p >= 256 and (up_dim_p // 128) % 2 == 0:
            tn = min(tn, up_dim_p // 2)
    tn = min(_round_up(tn, 128), up_dim_p)

    def _need_b(tn_):
        # Double-buffered tiles of the upmapping kernel.
        return 2 * (tb * fan_out_p * 2          # h tile (bf16)
                    + fan_out_p * tn_ * 2       # wu tile (bf16)
                    + tn_ * 4                   # bu tile (f32)
                    + tb * tn_ * out_bytes)     # output tile

    while tn > 128 and _need_b(tn) > vmem_cap // 2:
        tn = _round_up(tn // 2, 128)
    n_n = _cdiv(up_dim_p, tn)
    tn = _round_up(_cdiv(up_dim_p, n_n), 128)    # balance tiles, minimal pad
    up_dim_pp = n_n * tn

    # ----- pad / cast parameters (weights bf16, biases f32) ------------------
    x_p = _pad2(x.astype(bf16), batch_p, fan_in_p)
    w1 = _pad2(params["w1"].astype(bf16), fan_in_p, fan_in_p)
    b1 = _pad2(params["b1"].astype(f32), 1, fan_in_p)
    w2 = _pad2(params["w2"].astype(bf16), fan_in_p, fan_out_p)
    b2 = _pad2(params["b2"].astype(f32), 1, fan_out_p)
    w3 = _pad2(params["w3"].astype(bf16), fan_out_p, fan_out_p)
    b3 = _pad2(params["b3"].astype(f32), 1, fan_out_p)
    wu = _pad2(params["wu"].astype(bf16), fan_out_p, up_dim_pp)
    bu = _pad2(params["bu"].astype(f32), 1, up_dim_pp)

    # ----- kernel A: fc chain -> h (tiny; one grid step per batch tile) ------
    # Resident weights are counted double-buffered in the estimate (constant
    # index_map, so the pipeline holds 2 copies in the worst case).
    need_a = (2 * (tb * fan_in_p * 2 + tb * fan_out_p * 2)
              + 2 * ((fan_in_p * fan_in_p + fan_in_p * fan_out_p
                      + fan_out_p * fan_out_p) * 2
                     + (fan_in_p + 2 * fan_out_p) * 4))
    h_p = pl.pallas_call(
        act_chain_kernel,
        out_shape=jax.ShapeDtypeStruct((batch_p, fan_out_p), bf16),
        grid_spec=pltpu.PrefetchScalarGridSpec(
            num_scalar_prefetch=0,
            grid=(n_b,),
            in_specs=[
                pl.BlockSpec((tb, fan_in_p), lambda bi: (bi, 0)),         # x
                pl.BlockSpec((fan_in_p, fan_in_p), lambda bi: (0, 0)),    # w1
                pl.BlockSpec((1, fan_in_p), lambda bi: (0, 0)),           # b1
                pl.BlockSpec((fan_in_p, fan_out_p), lambda bi: (0, 0)),   # w2
                pl.BlockSpec((1, fan_out_p), lambda bi: (0, 0)),          # b2
                pl.BlockSpec((fan_out_p, fan_out_p), lambda bi: (0, 0)),  # w3
                pl.BlockSpec((1, fan_out_p), lambda bi: (0, 0)),          # b3
            ],
            out_specs=pl.BlockSpec((tb, fan_out_p), lambda bi: (bi, 0)),
        ),
        compiler_params=pltpu.CompilerParams(
            dimension_semantics=("parallel",),
            vmem_limit_bytes=_vmem_limit(need_a, vmem_cap)),
        cost_estimate=pl.CostEstimate(
            flops=int(2 * batch * (fan_in * fan_in + fan_in * fan_out
                                   + fan_out * fan_out)),
            transcendentals=int(batch * (fan_in + 2 * fan_out)),
            bytes_accessed=int(batch * fan_in * 2
                               + (fan_in * fan_in + fan_in * fan_out
                                  + fan_out * fan_out) * 2
                               + (fan_in + 2 * fan_out) * 4
                               + batch * fan_out * 2)),
    )(x_p, w1, b1, w2, b2, w3, b3)

    # ----- kernel B: out = h @ wu + bu (bandwidth-bound streams) -------------
    need_b = _need_b(tn)
    out_p = pl.pallas_call(
        upmapping_kernel,
        out_shape=jax.ShapeDtypeStruct((batch_p, up_dim_pp), out_dtype),
        grid_spec=pltpu.PrefetchScalarGridSpec(
            num_scalar_prefetch=0,
            grid=(n_b, n_n),
            in_specs=[
                pl.BlockSpec((tb, fan_out_p), lambda bi, ni: (bi, 0)),    # h
                pl.BlockSpec((fan_out_p, tn), lambda bi, ni: (0, ni)),    # wu
                pl.BlockSpec((1, tn), lambda bi, ni: (0, ni)),            # bu
            ],
            out_specs=pl.BlockSpec((tb, tn), lambda bi, ni: (bi, ni)),
        ),
        compiler_params=pltpu.CompilerParams(
            dimension_semantics=("parallel", "parallel"),
            vmem_limit_bytes=_vmem_limit(need_b, vmem_cap)),
        cost_estimate=pl.CostEstimate(
            flops=int(2 * batch * fan_out * up_dim),
            transcendentals=0,
            bytes_accessed=int(batch * fan_out * 2
                               + n_b * fan_out * up_dim * 2   # wu per batch tile
                               + up_dim * 4
                               + batch * up_dim * out_bytes)),
    )(h_p, wu, bu)

    return out_p[:batch, :up_dim]


# ----------------------------- test harness ---------------------------------

def init_params(key, fan_in, fan_out, prefix_size, hidden_dim):
    """Deterministic synthetic params (shapes match Actor_BC.__init__).

    Weights stored transposed w.r.t. nn.Linear, i.e. (in, out), in bf16;
    biases (1, out) in f32.
    """
    ks = jax.random.split(key, 8)
    up_dim = prefix_size * hidden_dim

    def lin(kw, kb, d_in, d_out):
        w = (jax.random.normal(kw, (d_in, d_out), jnp.float32)
             / jnp.sqrt(d_in)).astype(jnp.bfloat16)
        b = jax.random.normal(kb, (1, d_out), jnp.float32) * 0.01
        return w, b

    w1, b1 = lin(ks[0], ks[1], fan_in, fan_in)
    w2, b2 = lin(ks[2], ks[3], fan_in, fan_out)
    w3, b3 = lin(ks[4], ks[5], fan_out, fan_out)
    wu, bu = lin(ks[6], ks[7], fan_out, up_dim)
    return dict(w1=w1, b1=b1, w2=w2, b2=b2, w3=w3, b3=b3, wu=wu, bu=bu)


def actor_bc_reference(x, p):
    """Pure-JAX reference matching the kernel's bf16/f32 mixed precision."""
    f = lambda a: a.astype(jnp.float32)
    h = jax.nn.silu(f(x) @ f(p["w1"]) + p["b1"]).astype(jnp.bfloat16)
    h = jax.nn.silu(f(h) @ f(p["w2"]) + p["b2"]).astype(jnp.bfloat16)
    h = jax.nn.silu(f(h) @ f(p["w3"]) + p["b3"]).astype(jnp.bfloat16)
    return f(h) @ f(p["wu"]) + p["bu"]


if __name__ == "__main__":
    # Small shapes consistent with the module's forward signature.
    batch = 4
    fan_in = 32
    fan_out = 16
    prefix_size = 2
    hidden_dim = 32   # module default is 4096; scaled down for the example

    key = jax.random.PRNGKey(0)
    kx, kp = jax.random.split(key)

    x = jax.random.normal(kx, (batch, fan_in), jnp.float32).astype(jnp.bfloat16)
    params = init_params(kp, fan_in, fan_out, prefix_size, hidden_dim)

    out = jax.block_until_ready(actor_bc_forward(x, params))
    ref = actor_bc_reference(x, params)

    assert out.shape == (batch, prefix_size * hidden_dim)
    out_f32 = out.astype(jnp.float32)
    max_diff = jnp.max(jnp.abs(out_f32 - ref))
    assert jnp.allclose(out_f32, ref, atol=2e-2, rtol=2e-2), \
        f"mismatch vs reference (max abs diff {max_diff})"

    print("KERNEL_OK")
</pallas_src>

<mosaic_0001>
module attributes {stable_mosaic.version = 11 : i64} {
  func.func @act_chain_kernel(%arg0: i32, %arg1: memref<16x32xbf16, #tpu.memory_space<vmem>>, %arg2: memref<32x32xbf16, #tpu.memory_space<vmem>>, %arg3: memref<1x32xf32, #tpu.memory_space<vmem>>, %arg4: memref<32x16xbf16, #tpu.memory_space<vmem>>, %arg5: memref<1x16xf32, #tpu.memory_space<vmem>>, %arg6: memref<16x16xbf16, #tpu.memory_space<vmem>>, %arg7: memref<1x16xf32, #tpu.memory_space<vmem>>, %arg8: memref<16x16xbf16, #tpu.memory_space<vmem>>) attributes {dimension_semantics = [#tpu.dimension_semantics<parallel>], iteration_bounds = array<i64: 1>, scalar_prefetch = 0 : i64, scratch_operands = 0 : i64, tpu.core_type = #tpu.core_type<tc>, window_params = [{transform_indices = @transform_0, window_bounds = array<i64: 16, 32>}, {pipeline_mode = #tpu.pipeline_mode<synchronous>, transform_indices = @transform_1, window_bounds = array<i64: 32, 32>}, {pipeline_mode = #tpu.pipeline_mode<synchronous>, transform_indices = @transform_2, window_bounds = array<i64: 1, 32>}, {pipeline_mode = #tpu.pipeline_mode<synchronous>, transform_indices = @transform_3, window_bounds = array<i64: 32, 16>}, {pipeline_mode = #tpu.pipeline_mode<synchronous>, transform_indices = @transform_4, window_bounds = array<i64: 1, 16>}, {pipeline_mode = #tpu.pipeline_mode<synchronous>, transform_indices = @transform_5, window_bounds = array<i64: 16, 16>}, {pipeline_mode = #tpu.pipeline_mode<synchronous>, transform_indices = @transform_6, window_bounds = array<i64: 1, 16>}, {transform_indices = @transform_7, window_bounds = array<i64: 16, 16>}]} {
    %c0 = arith.constant 0 : index
    %c0_0 = arith.constant 0 : index
    %0 = vector.load %arg1[%c0, %c0_0] : memref<16x32xbf16, #tpu.memory_space<vmem>>, vector<16x32xbf16>
    %c0_1 = arith.constant 0 : index
    %c0_2 = arith.constant 0 : index
    %1 = vector.load %arg2[%c0_1, %c0_2] : memref<32x32xbf16, #tpu.memory_space<vmem>>, vector<32x32xbf16>
    %cst = arith.constant dense<0.000000e+00> : vector<16x32xf32>
    %2 = tpu.matmul %0, %1, %cst {dimension_numbers = #tpu.dot_dimension_numbers<[1], [0], [0], [1], [0, 0, 1, 1], [], []>} : vector<16x32xbf16>, vector<32x32xbf16>, vector<16x32xf32> -> vector<16x32xf32>
    %c0_3 = arith.constant 0 : index
    %c0_4 = arith.constant 0 : index
    %3 = vector.load %arg3[%c0_3, %c0_4] : memref<1x32xf32, #tpu.memory_space<vmem>>, vector<1x32xf32>
    %4 = vector.broadcast %3 : vector<1x32xf32> to vector<16x32xf32>
    %5 = arith.addf %2, %4 : vector<16x32xf32>
    %6 = arith.negf %5 : vector<16x32xf32>
    %7 = math.exp %6 : vector<16x32xf32>
    %cst_5 = arith.constant 1.000000e+00 : f32
    %8 = vector.broadcast %cst_5 : f32 to vector<16x32xf32>
    %9 = arith.addf %8, %7 : vector<16x32xf32>
    %10 = arith.divf %8, %9 : vector<16x32xf32>
    %11 = arith.mulf %5, %10 : vector<16x32xf32>
    %12 = arith.truncf %11 : vector<16x32xf32> to vector<16x32xbf16>
    %c0_6 = arith.constant 0 : index
    %c0_7 = arith.constant 0 : index
    %13 = vector.load %arg4[%c0_6, %c0_7] : memref<32x16xbf16, #tpu.memory_space<vmem>>, vector<32x16xbf16>
    %cst_8 = arith.constant dense<0.000000e+00> : vector<16x16xf32>
    %14 = tpu.matmul %12, %13, %cst_8 {dimension_numbers = #tpu.dot_dimension_numbers<[1], [0], [0], [1], [0, 0, 1, 1], [], []>} : vector<16x32xbf16>, vector<32x16xbf16>, vector<16x16xf32> -> vector<16x16xf32>
    %c0_9 = arith.constant 0 : index
    %c0_10 = arith.constant 0 : index
    %15 = vector.load %arg5[%c0_9, %c0_10] : memref<1x16xf32, #tpu.memory_space<vmem>>, vector<1x16xf32>
    %16 = vector.broadcast %15 : vector<1x16xf32> to vector<16x16xf32>
    %17 = arith.addf %14, %16 : vector<16x16xf32>
    %18 = arith.negf %17 : vector<16x16xf32>
    %19 = math.exp %18 : vector<16x16xf32>
    %cst_11 = arith.constant 1.000000e+00 : f32
    %20 = vector.broadcast %cst_11 : f32 to vector<16x16xf32>
    %21 = arith.addf %20, %19 : vector<16x16xf32>
    %22 = arith.divf %20, %21 : vector<16x16xf32>
    %23 = arith.mulf %17, %22 : vector<16x16xf32>
    %24 = arith.truncf %23 : vector<16x16xf32> to vector<16x16xbf16>
    %c0_12 = arith.constant 0 : index
    %c0_13 = arith.constant 0 : index
    %25 = vector.load %arg6[%c0_12, %c0_13] : memref<16x16xbf16, #tpu.memory_space<vmem>>, vector<16x16xbf16>
    %cst_14 = arith.constant dense<0.000000e+00> : vector<16x16xf32>
    %26 = tpu.matmul %24, %25, %cst_14 {dimension_numbers = #tpu.dot_dimension_numbers<[1], [0], [0], [1], [0, 0, 1, 1], [], []>} : vector<16x16xbf16>, vector<16x16xbf16>, vector<16x16xf32> -> vector<16x16xf32>
    %c0_15 = arith.constant 0 : index
    %c0_16 = arith.constant 0 : index
    %27 = vector.load %arg7[%c0_15, %c0_16] : memref<1x16xf32, #tpu.memory_space<vmem>>, vector<1x16xf32>
    %28 = vector.broadcast %27 : vector<1x16xf32> to vector<16x16xf32>
    %29 = arith.addf %26, %28 : vector<16x16xf32>
    %30 = arith.negf %29 : vector<16x16xf32>
    %31 = math.exp %30 : vector<16x16xf32>
    %cst_17 = arith.constant 1.000000e+00 : f32
    %32 = vector.broadcast %cst_17 : f32 to vector<16x16xf32>
    %33 = arith.addf %32, %31 : vector<16x16xf32>
    %34 = arith.divf %32, %33 : vector<16x16xf32>
    %35 = arith.mulf %29, %34 : vector<16x16xf32>
    %36 = arith.truncf %35 : vector<16x16xf32> to vector<16x16xbf16>
    %c0_18 = arith.constant 0 : index
    %c0_19 = arith.constant 0 : index
    %37 = vector.load %arg8[%c0_18, %c0_19] : memref<16x16xbf16, #tpu.memory_space<vmem>>, vector<16x16xbf16>
    tpu.vector_store %arg8[%c0_18, %c0_19], %36 {strides = array<i32>} : memref<16x16xbf16, #tpu.memory_space<vmem>>, vector<16x16xbf16>,
    return
  }
  func.func @transform_0(%arg0: i32) -> (i32, i32) {
    %c0_i32 = arith.constant 0 : i32
    %c0_i32_0 = arith.constant 0 : i32
    return %arg0, %c0_i32 : i32, i32
  }
  func.func @transform_1(%arg0: i32) -> (i32, i32) {
    %c0_i32 = arith.constant 0 : i32
    %c0_i32_0 = arith.constant 0 : i32
    %c0_i32_1 = arith.constant 0 : i32
    return %c0_i32, %c0_i32_0 : i32, i32
  }
  func.func @transform_2(%arg0: i32) -> (i32, i32) {
    %c0_i32 = arith.constant 0 : i32
    %c0_i32_0 = arith.constant 0 : i32
    %c0_i32_1 = arith.constant 0 : i32
    return %c0_i32, %c0_i32_0 : i32, i32
  }
  func.func @transform_3(%arg0: i32) -> (i32, i32) {
    %c0_i32 = arith.constant 0 : i32
    %c0_i32_0 = arith.constant 0 : i32
    %c0_i32_1 = arith.constant 0 : i32
    return %c0_i32, %c0_i32_0 : i32, i32
  }
  func.func @transform_4(%arg0: i32) -> (i32, i32) {
    %c0_i32 = arith.constant 0 : i32
    %c0_i32_0 = arith.constant 0 : i32
    %c0_i32_1 = arith.constant 0 : i32
    return %c0_i32, %c0_i32_0 : i32, i32
  }
  func.func @transform_5(%arg0: i32) -> (i32, i32) {
    %c0_i32 = arith.constant 0 : i32
    %c0_i32_0 = arith.constant 0 : i32
    %c0_i32_1 = arith.constant 0 : i32
    return %c0_i32, %c0_i32_0 : i32, i32
  }
  func.func @transform_6(%arg0: i32) -> (i32, i32) {
    %c0_i32 = arith.constant 0 : i32
    %c0_i32_0 = arith.constant 0 : i32
    %c0_i32_1 = arith.constant 0 : i32
    return %c0_i32, %c0_i32_0 : i32, i32
  }
  func.func @transform_7(%arg0: i32) -> (i32, i32) {
    %c0_i32 = arith.constant 0 : i32
    %c0_i32_0 = arith.constant 0 : i32
    return %arg0, %c0_i32 : i32, i32
  }
}

</mosaic_0001>

<bundles_post_ra>
// kernel: tpu_custom_call.1
= control target key start
LH: loop header
LB: loop body
LE: loop exit
PB: predicated region body
PF: predicated region fallthrough
CT: control target
= control target key end

     0   :  { %12 = vsyncpa [#allocation3], 0  ;;  %s508_s0 = inlined_call_operand.vmem [shape: bf16[16,32], index: 0, kind: input, shape index: {}]   ;;  %s509_s1 = inlined_call_operand.vmem [shape: bf16[32,32], index: 1, kind: input, shape index: {}]   ;;  %s510_s2 = inlined_call_operand.vmem [shape: f32[1,32], index: 2, kind: input, shape index: {}]   ;;  %s511_s3 = inlined_call_operand.vmem [shape: bf16[32,16], index: 3, kind: input, shape index: {}]   ;;  %s512_s4 = inlined_call_operand.vmem [shape: f32[1,16], index: 4, kind: input, shape index: {}]   ;;  %s513_s5 = inlined_call_operand.hbm [shape: bf16[16,16], index: 5, kind: input, shape index: {}]   ;;  %s514_s6 = inlined_call_operand.vmem [shape: f32[1,16], index: 6, kind: input, shape index: {}]   ;;  %s515_s7 = inlined_call_operand.hbm [shape: bf16[16,16], index: 7, kind: output, shape index: {}]  }
   0x1   :  { %13 = vsyncpa [#allocation4], 0  ;;  %s28_s26 = sshll.u32 %s513_s5, 4  ;;  %s424_s27 = smov [#allocation2]   ;;  %s29_s26 = int_to_ptr.hbm [resolvable:$true] %s28_s26 }
   0x2   :  { %s30_s28 = sshll.u32 %s424_s27, 4  ;;  %s425_s29 = smov 64   ;;  %s31_s28 = int_to_ptr.vmem [resolvable:$true] %s30_s28 }
   0x3   :  { %s426_s30 = smov 4  }
   0x4   :  { %36 = dma.hbm_to_vmem [thread:$0]  %s29_s26, 128, %s31_s28, [#allocation3], %s425_s29, %s425_s29, %s426_s30  }
   0x5   :  { %420 = dma.done.wait [#allocation3], 128  }
   0x6   :  { %421 = vsyncadd [#allocation3], 4294967168  ;;  %v337_v0 = vld [vmem:[%s509_s1 + $0x8] sm:$0xff]  ;;  %v336_v1 = vld [vmem:[%s509_s1] sm:$0xff]  ;;  %vm71_vm0 = vcmask 261120   ;;  %s289_s21 = sshll.u32 %s515_s7, 4  ;;  %s290_s21 = int_to_ptr.hbm [resolvable:$true] %s289_s21 }
   0x7   :  { %81 = vmatpush.bf16.msra.mxu0 %v337_v0  ;;  %v335_v2 = vld [vmem:[%s508_s0] sm:$0xff]  ;;  %v339_v6 = vld [vmem:[%s511_s3 + $0x8] sm:$0xff] }
   0x8   :  { %v345_v3 = vld [vmem:[%s510_s2] ss:$0 sm:$0xff]  ;;  %159 = vmatpush.bf16.msra.mxu1 %v339_v6 }
   0x9   :  { %v338_v8 = vld [vmem:[%s511_s3] sm:$0xff] }
   0xa   :  { %v346_v39 = vld [vmem:[%s512_s4] ss:$0 sm:$0xff] }
   0xb   :  { %82 = vmatpush.bf16.msra.mxu0 %v336_v1  ;;  %v340_v43 = vld [vmem:[#allocation2] sm:$0xff] }
   0xc   :  { %160 = vmatpush.bf16.msra.mxu1 %v338_v8  ;;  %231 = vmatpush.bf16.msra.mxu2 %v340_v43 }
   0xe   :  { %314 = vmatmul.msk.bf16.vlgmr.msra.gmra.mxu0 %vm71_vm0, %v335_v2 }
  0x8b   :  { %v84_v4 = vpop.f32.mrf.mxu0 }
  0x8c   :  { %v85_v5 = vadd.f32 %v345_v3, %v84_v4 }
  0x8e   :  { %v315_v7 = vmul.f32 -1.442695, %v85_v5 }
  0x90   :  { %348 = vpow2.f32 %v315_v7 }
  0x93   :  { %v86_v9 = vpop.f32.mrf.mxu0 }
  0x94   :  { %v87_v10 = vadd.f32 %v345_v3, %v86_v9 }
  0x96   :  { %v349_v11 = vpop.eup %348  ;;  %v316_v12 = vmul.f32 -1.442695, %v87_v10 }
  0x97   :  { %v95_v13 = vadd.f32 1.0, %v349_v11 }
  0x98   :  { %350 = vpow2.f32 %v316_v12 }
  0x99   :  { %352 = vrcp.f32 %v95_v13  ;;  %v108_v23 = vand.u32 2147483648, %v95_v13  ;;  %vm102_vm2 = vweird.f32 %v95_v13  ;;  %v106_v24 = vand.u32 2147483647, %v95_v13 }
  0x9b   :  { %v109_v30 = vor.u32 1.1754944e-38, %v108_v23  ;;  %vm107_vm5 = vcmp.eq.f32.partialorder %v106_v24, 8.507059e+37 }
  0x9e   :  { %v351_v14 = vpop.eup %350 }
  0x9f   :  { %v353_v15 = vpop.eup %352  ;;  %v96_v16 = vadd.f32 1.0, %v351_v14 }
  0xa0   :  { %v98_v17 = vmul.f32 %v353_v15, %v95_v13  ;;  %vm103_vm1 = vweird.f32 %v353_v15 }
  0xa1   :  { %354 = vrcp.f32 %v96_v16  ;;  %vm104_vm3 = vmor %vm102_vm2, %vm103_vm1  ;;  %v123_v26 = vand.u32 2147483648, %v96_v16  ;;  %v121_v29 = vand.u32 2147483647, %v96_v16  ;;  %vm117_vm6 = vweird.f32 %v96_v16 }
  0xa2   :  { %v99_v18 = vsub.f32 1.0, %v98_v17  ;;  %vm220_vm1 = vcmask 130048  }
  0xa3   :  { %v124_v33 = vor.u32 1.1754944e-38, %v123_v26  ;;  %vm122_vm8 = vcmp.eq.f32.partialorder %v121_v29, 8.507059e+37 }
  0xa4   :  { %v100_v19 = vmul.f32 %v353_v15, %v99_v18 }
  0xa6   :  { %v101_v21 = vadd.f32 %v353_v15, %v100_v19 }
  0xa7   :  { %v355_v20 = vpop.eup %354 }
  0xa8   :  { %v113_v22 = vmul.f32 %v355_v20, %v96_v16  ;;  %v105_v27 = vsel %vm104_vm3, %v353_v15, %v101_v21  ;;  %vm118_vm4 = vweird.f32 %v355_v20 }
  0xa9   :  { %v110_v32 = vsel %vm107_vm5, %v109_v30, %v105_v27  ;;  %vm119_vm7 = vmor %vm117_vm6, %vm118_vm4  ;;  %vm280_vm6 = vcmask 125952  }
  0xaa   :  { %v114_v25 = vsub.f32 1.0, %v113_v22  ;;  %v127_v36 = vmul.f32 %v110_v32, %v85_v5 }
  0xac   :  { %v115_v28 = vmul.f32 %v355_v20, %v114_v25 }
  0xae   :  { %v116_v31 = vadd.f32 %v355_v20, %v115_v28 }
  0xb0   :  { %v120_v34 = vsel %vm119_vm7, %v355_v20, %v116_v31 }
  0xb1   :  { %v125_v35 = vsel %vm122_vm8, %v124_v33, %v120_v34 }
  0xb2   :  { %v128_v37 = vmul.f32 %v125_v35, %v87_v10  ;;  %v347_v10 = vld [vmem:[%s514_s6] ss:$0 sm:$0xff]  ;;  %s427_s6 = smov [#allocation5]  }
  0xb3   :  { %s287_s18 = sshll.u32 %s427_s6, 4  ;;  %s288_s18 = int_to_ptr.vmem [resolvable:$true] %s287_s18 }
  0xb4   :  { %v129_v38 = vpack.c.bf16 %v128_v37, %v127_v36 }
  0xb6   :  { %325 = vmatmul.msk.bf16.vlgmr.msra.gmra.mxu1 %vm71_vm0, %v129_v38 }
 0x133   :  { %v162_v40 = vpop.f32.mrf.mxu1 }
 0x134   :  { %v163_v41 = vadd.f32 %v346_v39, %v162_v40 }
 0x136   :  { %v326_v42 = vmul.f32 -1.442695, %v163_v41 }
 0x138   :  { %356 = vpow2.f32 %v326_v42 }
 0x13b   :  { %v164_v44 = vpop.f32.mrf.mxu1 }
 0x13c   :  { %v165_v45 = vadd.f32 %v346_v39, %v164_v44 }
 0x13e   :  { %v357_v46 = vpop.eup %356  ;;  %v327_v47 = vmul.f32 -1.442695, %v165_v45 }
 0x13f   :  { %v173_v48 = vadd.f32 1.0, %v357_v46 }
 0x140   :  { %358 = vpow2.f32 %v327_v47 }
 0x141   :  { %360 = vrcp.f32 %v173_v48  ;;  %v186_v58 = vand.u32 2147483648, %v173_v48  ;;  %vm180_vm10 = vweird.f32 %v173_v48  ;;  %v184_v59 = vand.u32 2147483647, %v173_v48 }
 0x143   :  { %v187_v1 = vor.u32 1.1754944e-38, %v186_v58  ;;  %vm185_vm13 = vcmp.eq.f32.partialorder %v184_v59, 8.507059e+37 }
 0x146   :  { %v359_v49 = vpop.eup %358 }
 0x147   :  { %v361_v50 = vpop.eup %360  ;;  %v174_v51 = vadd.f32 1.0, %v359_v49 }
 0x148   :  { %v176_v52 = vmul.f32 %v361_v50, %v173_v48  ;;  %vm181_vm9 = vweird.f32 %v361_v50 }
 0x149   :  { %362 = vrcp.f32 %v174_v51  ;;  %vm182_vm11 = vmor %vm180_vm10, %vm181_vm9  ;;  %v201_v61 = vand.u32 2147483648, %v174_v51  ;;  %v199_v0 = vand.u32 2147483647, %v174_v51  ;;  %vm195_vm14 = vweird.f32 %v174_v51 }
 0x14a   :  { %v177_v53 = vsub.f32 1.0, %v176_v52 }
 0x14b   :  { %v202_v4 = vor.u32 1.1754944e-38, %v201_v61  ;;  %vm200_vm0 = vcmp.eq.f32.partialorder %v199_v0, 8.507059e+37 }
 0x14c   :  { %v178_v54 = vmul.f32 %v361_v50, %v177_v53 }
 0x14e   :  { %v179_v56 = vadd.f32 %v361_v50, %v178_v54 }
 0x14f   :  { %v363_v55 = vpop.eup %362 }
 0x150   :  { %v191_v57 = vmul.f32 %v363_v55, %v174_v51  ;;  %v183_v62 = vsel %vm182_vm11, %v361_v50, %v179_v56  ;;  %vm196_vm12 = vweird.f32 %v363_v55 }
 0x151   :  { %v188_v3 = vsel %vm185_vm13, %v187_v1, %v183_v62  ;;  %vm197_vm15 = vmor %vm195_vm14, %vm196_vm12 }
 0x152   :  { %v192_v60 = vsub.f32 1.0, %v191_v57  ;;  %v205_v7 = vmul.f32 %v188_v3, %v163_v41 }
 0x154   :  { %v193_v63 = vmul.f32 %v363_v55, %v192_v60 }
 0x156   :  { %v194_v2 = vadd.f32 %v363_v55, %v193_v63 }
 0x158   :  { %v198_v5 = vsel %vm197_vm15, %v363_v55, %v194_v2 }
 0x159   :  { %v203_v6 = vsel %vm200_vm0, %v202_v4, %v198_v5 }
 0x15a   :  { %v206_v8 = vmul.f32 %v203_v6, %v165_v45 }
 0x15c   :  { %v207_v9 = vpack.c.bf16 %v206_v8, %v205_v7 }
 0x15e   :  { %332 = vmatmul.msk.bf16.vlgmr.msra.gmra.mxu2 %vm220_vm1, %v207_v9 }
 0x1e1   :  { %v233_v11 = vpop.f32.mrf.mxu2 }
 0x1e2   :  { %v234_v12 = vadd.f32 %v347_v10, %v233_v11 }
 0x1e4   :  { %v333_v13 = vmul.f32 -1.442695, %v234_v12 }
 0x1e6   :  { %364 = vpow2.f32 %v333_v13 }
 0x1e9   :  { %v235_v14 = vpop.f32.mrf.mxu2 }
 0x1ea   :  { %v236_v15 = vadd.f32 %v347_v10, %v235_v14 }
 0x1ec   :  { %v365_v16 = vpop.eup %364  ;;  %v334_v17 = vmul.f32 -1.442695, %v236_v15 }
 0x1ed   :  { %v244_v18 = vadd.f32 1.0, %v365_v16 }
 0x1ee   :  { %366 = vpow2.f32 %v334_v17 }
 0x1ef   :  { %368 = vrcp.f32 %v244_v18  ;;  %v257_v24 = vand.u32 2147483648, %v244_v18  ;;  %v255_v26 = vand.u32 2147483647, %v244_v18  ;;  %vm251_vm3 = vweird.f32 %v244_v18 }
 0x1f1   :  { %v258_v29 = vor.u32 1.1754944e-38, %v257_v24  ;;  %vm256_vm5 = vcmp.eq.f32.partialorder %v255_v26, 8.507059e+37 }
 0x1f4   :  { %v367_v19 = vpop.eup %366 }
 0x1f5   :  { %v369_v20 = vpop.eup %368  ;;  %v245_v21 = vadd.f32 1.0, %v367_v19 }
 0x1f6   :  { %v247_v22 = vmul.f32 %v369_v20, %v244_v18  ;;  %vm252_vm2 = vweird.f32 %v369_v20 }
 0x1f7   :  { %370 = vrcp.f32 %v245_v21  ;;  %vm253_vm4 = vmor %vm251_vm3, %vm252_vm2  ;;  %v272_v35 = vand.u32 2147483648, %v245_v21  ;;  %v270_v38 = vand.u32 2147483647, %v245_v21  ;;  %vm266_vm8 = vweird.f32 %v245_v21 }
 0x1f8   :  { %v248_v23 = vsub.f32 1.0, %v247_v22 }
 0x1f9   :  { %v273_v40 = vor.u32 1.1754944e-38, %v272_v35  ;;  %vm271_vm10 = vcmp.eq.f32.partialorder %v270_v38, 8.507059e+37 }
 0x1fa   :  { %v249_v25 = vmul.f32 %v369_v20, %v248_v23 }
 0x1fc   :  { %v250_v27 = vadd.f32 %v369_v20, %v249_v25 }
 0x1fd   :  { %v371_v28 = vpop.eup %370 }
 0x1fe   :  { %v254_v30 = vsel %vm253_vm4, %v369_v20, %v250_v27  ;;  %v262_v31 = vmul.f32 %v371_v28, %v245_v21  ;;  %vm267_vm7 = vweird.f32 %v371_v28 }
 0x1ff   :  { %v259_v32 = vsel %vm256_vm5, %v258_v29, %v254_v30  ;;  %vm268_vm9 = vmor %vm266_vm8, %vm267_vm7 }
 0x200   :  { %v276_v33 = vmul.f32 %v259_v32, %v234_v12  ;;  %v263_v34 = vsub.f32 1.0, %v262_v31 }
 0x202   :  { %v278_v36 = vpack.c.bf16 %v276_v33, %v276_v33  ;;  %v264_v37 = vmul.f32 %v371_v28, %v263_v34 }
 0x204   :  { %v265_v39 = vadd.f32 %v371_v28, %v264_v37  ;;  %281 = vst.msk [vmem:[#allocation5] sm:$0xf] %vm280_vm6, %v278_v36 }
 0x206   :  { %v269_v41 = vsel %vm268_vm9, %v371_v28, %v265_v39 }
 0x207   :  { %v274_v42 = vsel %vm271_vm10, %v273_v40, %v269_v41 }
 0x208   :  { %v277_v43 = vmul.f32 %v274_v42, %v236_v15 }
 0x20a   :  { %v279_v44 = vpack.c.bf16 %v277_v43, %v277_v43 }
 0x20c   :  { %282 = vst.msk [vmem:[#allocation5 + $0x4] sm:$0xf] %vm280_vm6, %v279_v44 }
 0x20d   :  { %295 = dma.vmem_to_hbm [thread:$0]  %s288_s18, 128, %s290_s21, [#allocation4], %s425_s29, %s425_s29, %s426_s30  }
 0x20e   :  { %422 = dma.done.wait [#allocation4], 128  }
 0x20f   :  { %423 = vsyncadd [#allocation4], 4294967168 }
 0x210   :  { %300 = vsyncpa [#allocation3], 1 }
 0x211   :  { %301 = vsyncpa [#allocation4], 1 }

</bundles_post_ra>
